<compile_context>
chip_gen: v7x
topology: tpu7x:2x2x1
jax: 0.10.0
libtpu: 0.0.40
codegen_flags: <defaults>
</compile_context>

<pallas_src>
import functools

import jax
import jax.numpy as jnp
from jax import lax
from jax.experimental import pallas as pl
from jax.experimental.pallas import tpu as pltpu

_LANES = 128
_SUBLANES = 8
_EPS = 1e-5
_NUM_CORES = 2   # shard the reduction for v7x's 2 TensorCores; harmless on 1-TC chips


def _round_up(x, m):
    return ((x + m - 1) // m) * m


def _silog_partials_kernel(p_ref, t_ref, sum_ref, sumsq_ref, *,
                           d_min, n_rows, tile_rows, steps_per_core):
    """Accumulate per-lane/per-sublane partial sums of g and g^2.

    p_ref, t_ref       : (tile_rows, 128) blocks of predict / target (native dtype)
    sum_ref, sumsq_ref : (8, 128) f32 output blocks (one per core shard); they stay
                         resident in VMEM across the reduction axis and are
                         accumulated into directly (no VMEM scratch needed).
    """
    c = pl.program_id(0)          # core-shard index ("parallel" axis)
    i = pl.program_id(1)          # row-tile index within this shard ("arbitrary")

    @pl.when(i == 0)
    def _():
        sum_ref[...] = jnp.zeros_like(sum_ref)
        sumsq_ref[...] = jnp.zeros_like(sumsq_ref)

    p = p_ref[...]
    t = t_ref[...]

    # Row-validity mask: the grid is unpadded (pl.cdiv), so the last block and
    # any fully-out-of-range shard blocks contain garbage rows that must be
    # zeroed before accumulation.
    row = lax.broadcasted_iota(jnp.int32, (tile_rows, _LANES), 0)
    global_row = (c * steps_per_core + i) * tile_rows + row
    in_bounds = global_row < n_rows

    # Value mask in the input's native dtype (matches torch .ge(d_min)).
    keep = jnp.logical_and(
        jnp.logical_and(p >= jnp.asarray(d_min, dtype=p.dtype),
                        t >= jnp.asarray(d_min, dtype=t.dtype)),
        in_bounds)

    # log / accumulate in f32.  Masked positions give exactly 0, identical to
    # the PyTorch log(x*mask + 1e-5) - log(y*mask + 1e-5) formulation.
    eps = jnp.float32(_EPS)
    pf = p.astype(jnp.float32)
    tf = t.astype(jnp.float32)
    g = jnp.where(keep, jnp.log(pf + eps) - jnp.log(tf + eps), jnp.float32(0.0))

    # Pure-VPU accumulation: collapse only the vreg-batch dimension; no
    # cross-sublane / cross-lane reduce in the hot loop.
    g3 = g.reshape(tile_rows // _SUBLANES, _SUBLANES, _LANES)
    sum_ref[...] += jnp.sum(g3, axis=0)
    sumsq_ref[...] += jnp.sum(g3 * g3, axis=0)


def silog_loss(predict, target, lamb=0.85, d_min=0.001, max_tile_rows=2048):
    """Pallas implementation of SILogLoss.forward (scalar loss)."""
    assert predict.shape == target.shape, (predict.shape, target.shape)

    n = 1
    for s in predict.shape:
        n *= int(s)

    # Free bitcasts: flatten in native dtype (no astype, no copy).
    p_flat = predict.reshape(-1)
    t_flat = target.reshape(-1)

    # Lane packing.  When n is a multiple of 128 (the common case for depth
    # maps) the (n_rows, 128) reshape is a free bitcast and nothing is copied.
    # Otherwise we pay one small zero-pad; the padded zeros are mask-neutral
    # (0 < d_min => g == 0 there).
    rem = n % _LANES
    if rem:
        p_flat = jnp.pad(p_flat, (0, _LANES - rem))
        t_flat = jnp.pad(t_flat, (0, _LANES - rem))
    n_rows = p_flat.shape[0] // _LANES
    p2 = p_flat.reshape(n_rows, _LANES)
    t2 = t_flat.reshape(n_rows, _LANES)

    tile_rows = min(_round_up(max_tile_rows, _SUBLANES),
                    _round_up(n_rows, _SUBLANES))
    steps_total = pl.cdiv(n_rows, tile_rows)
    steps_per_core = pl.cdiv(steps_total, _NUM_CORES)
    last_block = steps_total - 1

    def in_map(c, i):
        # Clamp so fully-out-of-range shard blocks re-read the last valid
        # block (in-bounds DMA); the kernel's row mask zeroes their contribution.
        return (jnp.minimum(c * steps_per_core + i, last_block), 0)

    kernel = functools.partial(
        _silog_partials_kernel, d_min=float(d_min), n_rows=n_rows,
        tile_rows=tile_rows, steps_per_core=steps_per_core)

    bytes_in = n * (predict.dtype.itemsize + target.dtype.itemsize)
    cost = pl.CostEstimate(
        flops=10 * n, transcendentals=2 * n,
        bytes_accessed=bytes_in + 2 * _NUM_CORES * _SUBLANES * _LANES * 4)

    part_s, part_q = pl.pallas_call(
        kernel,
        out_shape=(
            jax.ShapeDtypeStruct((_NUM_CORES, _SUBLANES, _LANES), jnp.float32),
            jax.ShapeDtypeStruct((_NUM_CORES, _SUBLANES, _LANES), jnp.float32),
        ),
        grid_spec=pltpu.PrefetchScalarGridSpec(
            num_scalar_prefetch=0,
            grid=(_NUM_CORES, steps_per_core),
            in_specs=[
                pl.BlockSpec((tile_rows, _LANES), in_map),
                pl.BlockSpec((tile_rows, _LANES), in_map),
            ],
            out_specs=[
                pl.BlockSpec((None, _SUBLANES, _LANES), lambda c, i: (c, 0, 0)),
                pl.BlockSpec((None, _SUBLANES, _LANES), lambda c, i: (c, 0, 0)),
            ],
        ),
        compiler_params=pltpu.CompilerParams(
            dimension_semantics=("parallel", "arbitrary")),
        cost_estimate=cost,
    )(p2, t2)

    # Tiny finalization on the (2, 8, 128) partials; use the TRUE element count.
    nf = jnp.float32(n)
    s1 = jnp.sum(part_s)
    s2 = jnp.sum(part_q)
    mean_g = s1 / nf
    # torch.var default is unbiased (divide by N - 1).
    # NOTE: sum-of-squares variance in f32 can cancel when var << mean^2 and N
    # is huge; acceptable for depth-map losses (torch also finalizes in f32).
    var_g = (s2 - nf * mean_g * mean_g) / (nf - 1.0)
    dg = var_g + jnp.float32(1.0 - lamb) * mean_g * mean_g
    return jnp.sqrt(dg)


def _ref_silog(predict, target, lamb=0.85, d_min=0.001):
    """Pure-JAX reference matching the PyTorch module, for sanity checking."""
    p = predict.astype(jnp.float32)
    t = target.astype(jnp.float32)
    mask = jnp.logical_and(p >= d_min, t >= d_min).astype(jnp.float32)
    g = (jnp.log(p * mask + _EPS) - jnp.log(t * mask + _EPS)).reshape(-1)
    n = g.shape[0]
    mean = jnp.mean(g)
    var = jnp.sum((g - mean) ** 2) / (n - 1)   # unbiased, like torch.var default
    dg = var + (1.0 - lamb) * mean * mean
    return jnp.sqrt(dg)


if __name__ == "__main__":
    key = jax.random.PRNGKey(0)
    k1, k2, k3, k4 = jax.random.split(key, 4)

    B, C, H, W = 2, 1, 16, 16   # depth maps, NCHW
    predict = jax.random.uniform(k1, (B, C, H, W), jnp.float32,
                                 minval=0.0, maxval=10.0)
    target = jax.random.uniform(k2, (B, C, H, W), jnp.float32,
                                minval=0.0, maxval=10.0)
    # Zero out ~30% of each so the d_min mask is actually exercised.
    predict = jnp.where(jax.random.uniform(k3, (B, C, H, W)) < 0.3, 0.0, predict)
    target = jnp.where(jax.random.uniform(k4, (B, C, H, W)) < 0.3, 0.0, target)

    loss = jax.block_until_ready(silog_loss(predict, target,
                                            lamb=0.85, d_min=0.001))
    ref = jax.block_until_ready(_ref_silog(predict, target,
                                           lamb=0.85, d_min=0.001))
    assert jnp.allclose(loss, ref, rtol=1e-4, atol=1e-5), (loss, ref)

    print("KERNEL_OK")
</pallas_src>

<mosaic_0001>
module attributes {stable_mosaic.version = 11 : i64} {
  func.func @_silog_partials_kernel(%arg0: i32, %arg1: i32, %arg2: memref<8x128xf32, #tpu.memory_space<vmem>>, %arg3: memref<8x128xf32, #tpu.memory_space<vmem>>, %arg4: memref<1x8x128xf32, #tpu.memory_space<vmem>>, %arg5: memref<1x8x128xf32, #tpu.memory_space<vmem>>) attributes {dimension_semantics = [#tpu.dimension_semantics<parallel>, #tpu.dimension_semantics<arbitrary>], iteration_bounds = array<i64: 2, 1>, scalar_prefetch = 0 : i64, scratch_operands = 0 : i64, tpu.core_type = #tpu.core_type<tc>, window_params = [{transform_indices = @transform_0, window_bounds = array<i64: 8, 128>}, {transform_indices = @transform_1, window_bounds = array<i64: 8, 128>}, {transform_indices = @transform_2, window_bounds = array<i64: 1, 8, 128>}, {transform_indices = @transform_3, window_bounds = array<i64: 1, 8, 128>}]} {
    %c0_i32 = arith.constant 0 : i32
    %0 = arith.cmpi eq, %arg1, %c0_i32 : i32
    %1 = arith.extui %0 : i1 to i32
    %c0_i32_0 = arith.constant 0 : i32
    %2 = arith.cmpi ne, %1, %c0_i32_0 : i32
    scf.if %2 {
      %cst_22 = arith.constant 0.000000e+00 : f32
      %44 = vector.broadcast %cst_22 : f32 to vector<8x128xf32>
      %c0_23 = arith.constant 0 : index
      %c0_24 = arith.constant 0 : index
      %c0_25 = arith.constant 0 : index
      %45 = vector.load %arg4[%c0_23, %c0_24, %c0_25] : memref<1x8x128xf32, #tpu.memory_space<vmem>>, vector<1x8x128xf32>
      %46 = vector.shape_cast %45 : vector<1x8x128xf32> to vector<8x128xf32>
      %47 = vector.shape_cast %44 : vector<8x128xf32> to vector<1x8x128xf32>
      tpu.vector_store %arg4[%c0_23, %c0_24, %c0_25], %47 {strides = array<i32>} : memref<1x8x128xf32, #tpu.memory_space<vmem>>, vector<1x8x128xf32>,
      %cst_26 = arith.constant 0.000000e+00 : f32
      %48 = vector.broadcast %cst_26 : f32 to vector<8x128xf32>
      %c0_27 = arith.constant 0 : index
      %c0_28 = arith.constant 0 : index
      %c0_29 = arith.constant 0 : index
      %49 = vector.load %arg5[%c0_27, %c0_28, %c0_29] : memref<1x8x128xf32, #tpu.memory_space<vmem>>, vector<1x8x128xf32>
      %50 = vector.shape_cast %49 : vector<1x8x128xf32> to vector<8x128xf32>
      %51 = vector.shape_cast %48 : vector<8x128xf32> to vector<1x8x128xf32>
      tpu.vector_store %arg5[%c0_27, %c0_28, %c0_29], %51 {strides = array<i32>} : memref<1x8x128xf32, #tpu.memory_space<vmem>>, vector<1x8x128xf32>,
    } else {
    }
    %c0 = arith.constant 0 : index
    %c0_1 = arith.constant 0 : index
    %3 = vector.load %arg2[%c0, %c0_1] : memref<8x128xf32, #tpu.memory_space<vmem>>, vector<8x128xf32>
    %c0_2 = arith.constant 0 : index
    %c0_3 = arith.constant 0 : index
    %4 = vector.load %arg3[%c0_2, %c0_3] : memref<8x128xf32, #tpu.memory_space<vmem>>, vector<8x128xf32>
    %5 = tpu.iota {dimensions = array<i32: 0>} : vector<8x128xi32>
    %c1_i32 = arith.constant 1 : i32
    %6 = arith.muli %arg0, %c1_i32 : i32
    %7 = arith.addi %6, %arg1 : i32
    %c8_i32 = arith.constant 8 : i32
    %8 = arith.muli %7, %c8_i32 : i32
    %9 = vector.broadcast %8 : i32 to vector<8x128xi32>
    %10 = arith.addi %9, %5 : vector<8x128xi32>
    %c4_i32 = arith.constant 4 : i32
    %11 = vector.broadcast %c4_i32 : i32 to vector<8x128xi32>
    %12 = arith.cmpi slt, %10, %11 : vector<8x128xi32>
    %cst = arith.constant 1.000000e-03 : f32
    %13 = vector.broadcast %cst : f32 to vector<8x128xf32>
    %14 = arith.cmpf oge, %3, %13 : vector<8x128xf32>
    %cst_4 = arith.constant 1.000000e-03 : f32
    %15 = vector.broadcast %cst_4 : f32 to vector<8x128xf32>
    %16 = arith.cmpf oge, %4, %15 : vector<8x128xf32>
    %17 = arith.andi %14, %16 : vector<8x128xi1>
    %18 = arith.andi %17, %12 : vector<8x128xi1>
    %cst_5 = arith.constant 9.99999974E-6 : f32
    %19 = vector.broadcast %cst_5 : f32 to vector<8x128xf32>
    %20 = arith.addf %3, %19 : vector<8x128xf32>
    %21 = math.log %20 : vector<8x128xf32>
    %cst_6 = arith.constant 9.99999974E-6 : f32
    %22 = vector.broadcast %cst_6 : f32 to vector<8x128xf32>
    %23 = arith.addf %4, %22 : vector<8x128xf32>
    %24 = math.log %23 : vector<8x128xf32>
    %25 = arith.subf %21, %24 : vector<8x128xf32>
    %cst_7 = arith.constant 0.000000e+00 : f32
    %26 = vector.broadcast %cst_7 : f32 to vector<8x128xf32>
    %27 = arith.select %18, %25, %26 : vector<8x128xi1>, vector<8x128xf32>
    %28 = vector.shape_cast %27 : vector<8x128xf32> to vector<1x8x128xf32>
    %c0_8 = arith.constant 0 : index
    %c0_9 = arith.constant 0 : index
    %c0_10 = arith.constant 0 : index
    %29 = vector.load %arg4[%c0_8, %c0_9, %c0_10] : memref<1x8x128xf32, #tpu.memory_space<vmem>>, vector<1x8x128xf32>
    %30 = vector.shape_cast %29 : vector<1x8x128xf32> to vector<8x128xf32>
    %cst_11 = arith.constant dense<0.000000e+00> : vector<8x128xf32>
    %31 = vector.multi_reduction <add>, %28, %cst_11 [0] : vector<1x8x128xf32> to vector<8x128xf32>
    %32 = arith.addf %30, %31 : vector<8x128xf32>
    %c0_12 = arith.constant 0 : index
    %c0_13 = arith.constant 0 : index
    %c0_14 = arith.constant 0 : index
    %33 = vector.load %arg4[%c0_12, %c0_13, %c0_14] : memref<1x8x128xf32, #tpu.memory_space<vmem>>, vector<1x8x128xf32>
    %34 = vector.shape_cast %33 : vector<1x8x128xf32> to vector<8x128xf32>
    %35 = vector.shape_cast %32 : vector<8x128xf32> to vector<1x8x128xf32>
    tpu.vector_store %arg4[%c0_12, %c0_13, %c0_14], %35 {strides = array<i32>} : memref<1x8x128xf32, #tpu.memory_space<vmem>>, vector<1x8x128xf32>,
    %c0_15 = arith.constant 0 : index
    %c0_16 = arith.constant 0 : index
    %c0_17 = arith.constant 0 : index
    %36 = vector.load %arg5[%c0_15, %c0_16, %c0_17] : memref<1x8x128xf32, #tpu.memory_space<vmem>>, vector<1x8x128xf32>
    %37 = vector.shape_cast %36 : vector<1x8x128xf32> to vector<8x128xf32>
    %38 = arith.mulf %28, %28 : vector<1x8x128xf32>
    %cst_18 = arith.constant dense<0.000000e+00> : vector<8x128xf32>
    %39 = vector.multi_reduction <add>, %38, %cst_18 [0] : vector<1x8x128xf32> to vector<8x128xf32>
    %40 = arith.addf %37, %39 : vector<8x128xf32>
    %c0_19 = arith.constant 0 : index
    %c0_20 = arith.constant 0 : index
    %c0_21 = arith.constant 0 : index
    %41 = vector.load %arg5[%c0_19, %c0_20, %c0_21] : memref<1x8x128xf32, #tpu.memory_space<vmem>>, vector<1x8x128xf32>
    %42 = vector.shape_cast %41 : vector<1x8x128xf32> to vector<8x128xf32>
    %43 = vector.shape_cast %40 : vector<8x128xf32> to vector<1x8x128xf32>
    tpu.vector_store %arg5[%c0_19, %c0_20, %c0_21], %43 {strides = array<i32>} : memref<1x8x128xf32, #tpu.memory_space<vmem>>, vector<1x8x128xf32>,
    return
  }
  func.func @transform_0(%arg0: i32, %arg1: i32) -> (i32, i32) {
    %c1_i32 = arith.constant 1 : i32
    %0 = arith.muli %arg0, %c1_i32 : i32
    %1 = arith.addi %0, %arg1 : i32
    %c0_i32 = arith.constant 0 : i32
    %2 = arith.minsi %1, %c0_i32 : i32
    %c0_i32_0 = arith.constant 0 : i32
    %c0_i32_1 = arith.constant 0 : i32
    return %2, %c0_i32_0 : i32, i32
  }
  func.func @transform_1(%arg0: i32, %arg1: i32) -> (i32, i32) {
    %c1_i32 = arith.constant 1 : i32
    %0 = arith.muli %arg0, %c1_i32 : i32
    %1 = arith.addi %0, %arg1 : i32
    %c0_i32 = arith.constant 0 : i32
    %2 = arith.minsi %1, %c0_i32 : i32
    %c0_i32_0 = arith.constant 0 : i32
    %c0_i32_1 = arith.constant 0 : i32
    return %2, %c0_i32_0 : i32, i32
  }
  func.func @transform_2(%arg0: i32, %arg1: i32) -> (i32, i32, i32) {
    %c0_i32 = arith.constant 0 : i32
    %c0_i32_0 = arith.constant 0 : i32
    %c0_i32_1 = arith.constant 0 : i32
    return %arg0, %c0_i32, %c0_i32_0 : i32, i32, i32
  }
  func.func @transform_3(%arg0: i32, %arg1: i32) -> (i32, i32, i32) {
    %c0_i32 = arith.constant 0 : i32
    %c0_i32_0 = arith.constant 0 : i32
    %c0_i32_1 = arith.constant 0 : i32
    return %arg0, %c0_i32, %c0_i32_0 : i32, i32, i32
  }
}

</mosaic_0001>

<bundles_post_ra>
// kernel: tpu_custom_call.1
= control target key start
LH: loop header
LB: loop body
LE: loop exit
PB: predicated region body
PF: predicated region fallthrough
CT: control target
= control target key end

     0   :  { %9 = vsyncpa [#allocation3], 0  ;;  %s1057_s0 = inlined_call_operand.hbm [shape: f32[4,128], index: 0, kind: input, shape index: {}]   ;;  %s1058_s1 = inlined_call_operand.hbm [shape: f32[4,128], index: 1, kind: input, shape index: {}]   ;;  %s1059_s2 = inlined_call_operand.hbm [shape: f32[2,8,128], index: 2, kind: output, shape index: {0}]   ;;  %s1060_s3 = inlined_call_operand.hbm [shape: f32[2,8,128], index: 3, kind: output, shape index: {1}]  }
   0x1   :  { %11 = vsyncpa [#allocation3 + $0x1], 0 }
   0x2   :  { %12 = vsyncpa [#allocation6], 0 }
   0x3   :  { %14 = vsyncpa [#allocation6 + $0x1], 0 }
   0x4   :  { %15 = vsyncpa [#allocation4], 0 }
   0x5   :  { %17 = vsyncpa [#allocation4 + $0x1], 0 }
   0x6   :  { %18 = vsyncpa [#allocation9], 0 }
   0x7   :  { %20 = vsyncpa [#allocation9 + $0x1], 0  ;;  %s847_s12 = smov 0   ;;  %s849_s13 = smov 0  }
   0x8   :  { %s851_s14 = smov 0   ;;  %s853_s15 = smov 0  }
   0x9   :  { %s855_s16 = smov 0   ;;  %s857_s17 = smov 0  }
   0xa   :  { %s859_s18 = smov 0   ;;  %s861_s19 = smov 0  }
   0xb LB: > { %s491_s20 = sadd.s32 4294967295, %s817_s19   ;;  %s492_s21 = sadd.s32 4294967294, %s817_s19   ;;  %s817_s19 = sphi %s861_s19, %s26_s19   ;;  %s813_s18 = sphi %s859_s18, %s1072_s18   ;;  %s809_s17 = sphi %s857_s17, %s1071_s17   ;;  %s805_s16 = sphi %s855_s16, %s1047_s16   ;;  %s801_s15 = sphi %s853_s15, %s1070_s15   ;;  %s797_s14 = sphi %s851_s14, %s1069_s14   ;;  %s793_s13 = sphi %s849_s13, %s1068_s13   ;;  %s789_s12 = sphi %s847_s12, %s1067_s12  }
   0xc   : > { %s38_s22 = sadd.s32 1, %s813_s18  ;;  %p786_p1 = scmp.ne.s32.totalorder %s805_s16, 0 }
   0xd   : > { %p40_p0 = scmp.ge.s32.totalorder %s38_s22, 2  ;;  %p59_p2 = scmp.eq.s32.totalorder %s817_s19, 0 }
   0xe   : > { %p64_p3 = scmp.ne.s32.totalorder %s805_s16, %s801_s15  ;;  %p65_p5 = scmp.eq.s32.totalorder %s491_s20, 0 }
   0xf   : > { %s1074_s22 = smov (%p40_p0, %s38_s22), 0  ;;  %p893_p4 = por %p786_p1, %p59_p2 }
  0x10   : > { %p897_p6 = por %p65_p5, %p64_p3  ;;  %s106_s25 = ssub.s32 %s813_s18, %s1074_s22 }
  0x11   : > { %p107_p7 = scmp.eq.s32.totalorder %s106_s25, 0  ;;  %s109_s26 = sadd.s32 1, %s797_s14 }
  0x12   : > { %p119_p8 = scmp.ne.s32.totalorder %s797_s14, %s793_s13  ;;  %p120_p9 = scmp.eq.s32.totalorder %s491_s20, 1 }
  0x13   : > { %s905_s27 = scalar_select %p107_p7, %s797_s14, %s109_s26  }
  0x14   : > { %p125_p10 = scmp.ne.s32.totalorder %s793_s13, %s789_s12  ;;  %p126_p11 = scmp.eq.s32.totalorder %s492_s21, 1 }
  0x15   : > { %p911_p12 = por %p120_p9, %p119_p8  ;;  %p1061_p0 = scmp.ge.s32.totalorder %s817_s19, 2 }
  0x16   : > { %p915_p13 = por %p126_p11, %p125_p10 }
  0x17   : > { %168 = sbr.rel (%p1061_p0) target bundleno = 84 (0x54), region = 16 }
  0x1e   : > { %171 = sbr.rel (!%p893_p4) target bundleno = 57 (0x39), region = 20 }
  0x25   : > { %185 = vsyncadd [#allocation3], 64  ;;  %s819_s30 = smov [#allocation2]   ;;  %s618_s7 = scalar_lea.hbm %s1057_s0, 64 }
  0x26   : > { %s190_s4 = sshll.u32 %s819_s30, 4  ;;  %p619_p1 = scmp.ne.s32.totalorder %s1057_s0, %s618_s7  ;;  %s191_s4 = int_to_ptr.vmem [resolvable:$true] %s190_s4 }
  0x27   : > { %p624_p2 = scmp.lt.u32.totalorder %s618_s7, %s618_s7  ;;  %p626_p3 = scmp.lt.u32.totalorder %s618_s7, %s1057_s0 }
  0x29   : > { %p627_p5 = por %p626_p3, %p624_p2 }
  0x2b   : > { %p628_p7 = pnand %p627_p5, %p619_p1 }
  0x2d   : > { %631 = shalt.err (!%p628_p7)
}
  0x2e   : > { %s632_s15 = scalar_lea.vmem %s191_s4, 64  ;;  %s638_s20 = scalar_lea.vmem %s191_s4, 256 }
  0x2f   : > { %p633_p8 = scmp.ne.s32.totalorder %s191_s4, %s632_s15  ;;  %p639_p9 = scmp.lt.s32.totalorder %s191_s4, %s191_s4 }
  0x30   : > { %p640_p10 = scmp.lt.s32.totalorder %s638_s20, %s632_s15 }
  0x32   : > { %p641_p11 = por %p640_p10, %p639_p9 }
  0x34   : > { %p642_p0 = pnand %p641_p11, %p633_p8 }
  0x36   : > { %645 = shalt.err (!%p642_p0)
}
  0x37   : > { %s820_s21 = smov 64   ;;  %s821_s25 = smov 4  }
  0x38   : > { %196 = dma.hbm_to_vmem [thread:$0]  %s1057_s0, 64, %s191_s4, [#allocation3], %s820_s21, %s820_s21, %s821_s25  }
  0x39 PF: > { %199 = sbr.rel (!%p893_p4) target bundleno = 84 (0x54), region = 24 }
  0x40   : > { %213 = vsyncadd [#allocation6], 64  ;;  %s822_s5 = smov [#allocation5]   ;;  %s646_s9 = scalar_lea.hbm %s1058_s1, 64 }
  0x41   : > { %s218_s6 = sshll.u32 %s822_s5, 4  ;;  %p647_p0 = scmp.ne.s32.totalorder %s1058_s1, %s646_s9  ;;  %s219_s6 = int_to_ptr.vmem [resolvable:$true] %s218_s6 }
  0x42   : > { %p652_p1 = scmp.lt.u32.totalorder %s646_s9, %s646_s9  ;;  %p654_p2 = scmp.lt.u32.totalorder %s646_s9, %s1058_s1 }
  0x44   : > { %p655_p3 = por %p654_p2, %p652_p1 }
  0x46   : > { %p656_p5 = pnand %p655_p3, %p647_p0 }
  0x48   : > { %659 = shalt.err (!%p656_p5)
}
  0x49   : > { %s660_s23 = scalar_lea.vmem %s219_s6, 64  ;;  %s666_s4 = scalar_lea.vmem %s219_s6, 256 }
  0x4a   : > { %p661_p4 = scmp.ne.s32.totalorder %s219_s6, %s660_s23  ;;  %p667_p7 = scmp.lt.s32.totalorder %s219_s6, %s219_s6 }
  0x4b   : > { %p668_p8 = scmp.lt.s32.totalorder %s666_s4, %s660_s23 }
  0x4d   : > { %p669_p9 = por %p668_p8, %p667_p7 }
  0x4f   : > { %p670_p10 = pnand %p669_p9, %p661_p4 }
  0x51   : > { %673 = shalt.err (!%p670_p10)
}
  0x52   : > { %s823_s21 = smov 64   ;;  %s824_s25 = smov 4  }
  0x53   : > { %224 = dma.hbm_to_vmem [thread:$0]  %s1058_s1, 64, %s219_s6, [#allocation6], %s823_s21, %s823_s21, %s824_s25  }
  0x54 PF: > { %p509_p11 = scmp.ge.s32.totalorder %s817_s19, 1  ;;  %p226_p0 = scmp.lt.s32.totalorder %s817_s19, 3 }
  0x56   : > { %p227_p1 = pnand %p509_p11, %p226_p0 }
  0x57   : > { %s232_s5 = sand.u32 (!%p227_p1), 1, %s805_s16  }
  0x58   : > { %230 = sbr.rel (%p227_p1) target bundleno = 155 (0x9b), region = 28  ;;  %s510_s7 = sshll.u32 (!%p227_p1), %s232_s5, 3 }
  0x59   : > { %s233_s8 = scalar_lea.sflag (!%p227_p1), [#allocation3], %s232_s5  ;;  %s236_s9 = scalar_lea.vmem (!%p227_p1), [#allocation2], %s510_s7 }
  0x5f   : > { %767 = dma.done.wait (%p897_p6), %s233_s8, 128  }
  0x60   : > { %769 = vsyncadd (%p897_p6), %s233_s8, 4294967168  ;;  %s242_s6 = scalar_lea.sflag [#allocation6], %s232_s5  ;;  %s245_s10 = scalar_lea.vmem [#allocation5], %s510_s7 }
  0x61   : > { %771 = dma.done.wait (%p897_p6), %s242_s6, 128  }
  0x62   : > { %773 = vsyncadd (%p897_p6), %s242_s6, 4294967168  ;;  %v296_v0 = vld [vmem:[%s236_s9] sm:$0xff]  ;;  %v297_v1 = vld [vmem:[%s245_s10] sm:$0xff]  ;;  %v298_v2 = vlaneseq  ;;  %s514_s11 = sshll.u32 %s809_s17, 3  ;;  %s963_s15 = sand.u32 1, %s793_s13  }
  0x63   : > { %v309_v3 = vadd.f32 1e-05, %v296_v0  ;;  %v312_v4 = vadd.f32 1e-05, %v297_v1  ;;  %v302_v6 = vstv %s514_s11  ;;  %vm305_vm0 = vcmp.ge.f32.partialorder %v296_v0, 0.001 }
  0x64   : > { %v299_v5 = vshrl.u32 %v298_v2, 7  ;;  %vm306_vm1 = vcmp.ge.f32.partialorder %v297_v1, 0.001  ;;  %s512_s24 = sshll.u32 %s963_s15, 3  ;;  %s517_s20 = sshll.u32 %s809_s17, 7 }
  0x65   : > { %614 = vlog2.f32 %v309_v3  ;;  %vm307_vm3 = vmand %vm305_vm0, %vm306_vm1  ;;  %s270_s23 = scalar_lea.vmem [#allocation7], %s512_s24  ;;  %s967_s21 = scalar_lea.vmem [#allocation8], %s512_s24 }
  0x66   : > { %616 = vlog2.f32 %v312_v4  ;;  %v303_v7 = vadd.s32 %v302_v6, %v299_v5  ;;  %s345_s4 = sshll.u32 %s270_s23, 4  ;;  %s358_s25 = sshll.u32 %s967_s21, 4  ;;  %s975_s4 = int_to_ptr.vmem [resolvable:$true] %s345_s4  ;;  %s982_s25 = int_to_ptr.vmem [resolvable:$true] %s358_s25 }
  0x67   : > { %s973_s5 = scalar_lea.hbm %s1059_s2, %s517_s20  ;;  %s980_s8 = scalar_lea.hbm %s1060_s3, %s517_s20 }
  0x68   : > { %vm304_vm2 = vcmp.lt.s32.totalorder %v303_v7, 4  ;;  %s327_s9 = scalar_lea.sflag [#allocation4], %s963_s15  ;;  %s674_s6 = scalar_lea.vmem %s975_s4, 128 }
  0x69   : > { %vm308_vm4 = vmand %vm307_vm3, %vm304_vm2  ;;  %p675_p6 = scmp.ne.s32.totalorder %s975_s4, %s674_s6  ;;  %s825_s10 = smov [#allocation7]  }
  0x6a   : > { %s678_s11 = sshll.u32 %s825_s10, 4  ;;  %s679_s11 = int_to_ptr.vmem [resolvable:$false] %s678_s11 }
  0x6b   : > { %p676_p2 = pnand %p675_p6, %p911_p12  ;;  %s680_s24 = scalar_lea.vmem %s679_s11, 256 }
  0x6c   : > { %p681_p5 = scmp.lt.s32.totalorder %s975_s4, %s679_s11  ;;  %p682_p4 = scmp.lt.s32.totalorder %s680_s24, %s674_s6 }
  0x6d   : > { %p677_p3 = pneg %p676_p2 }
  0x6e   : > { %p683_p7 = por %p682_p4, %p681_p5 }
  0x6f   : > { %v615_v8 = vpop.eup %614 }
  0x70   : > { %v617_v9 = vpop.eup %616  ;;  %v311_v10 = vmul.f32 0.6931472, %v615_v8  ;;  %p684_p8 = pnand %p683_p7, %p677_p3 }
  0x71   : > { %v314_v11 = vmul.f32 0.6931472, %v617_v9 }
  0x73   : > { %v315_v12 = vsub.f32 %v311_v10, %v314_v11 }
  0x75   : > { %v316_v13 = vsel %vm308_vm4, %v315_v12, 0.0 }
  0x76   : > { %v322_v14 = vmul.f32 %v316_v13, %v316_v13  ;;  %320 = vst [vmem:[%s270_s23] sm:$0xff] %v316_v13 }
  0x77   : > { %687 = shalt.err (!%p684_p8)
}
  0x78   : > { %s688_s20 = scalar_lea.hbm %s973_s5, 128  ;;  %s692_s30 = scalar_lea.hbm %s1059_s2, 256 }
  0x79   : > { %p689_p9 = scmp.ne.s32.totalorder %s973_s5, %s688_s20  ;;  %p693_p0 = scmp.lt.u32.totalorder %s973_s5, %s1059_s2 }
  0x7a   : > { %p694_p1 = scmp.lt.u32.totalorder %s692_s30, %s688_s20  ;;  %p696_p2 = scmp.lt.u32.totalorder %s688_s20, %s973_s5 }
  0x7b   : > { %p690_p10 = pnand %p689_p9, %p911_p12 }
  0x7c   : > { %p695_p6 = por %p694_p1, %p693_p0 }
  0x7d   : > { %p691_p11 = pneg %p690_p10 }
  0x7e   : > { %p697_p3 = por %p696_p2, %p695_p6 }
  0x80   : > { %p698_p5 = pnand %p697_p3, %p691_p11 }
  0x82   : > { %701 = shalt.err (!%p698_p5)
}
  0x83   : > { %525 = dma.vmem_to_hbm [thread:$0]  (%p911_p12), %s975_s4, 128, %s973_s5, %s327_s9   ;;  %325 = vst [vmem:[%s967_s21] sm:$0xff] %v322_v14 }
  0x84   : > { %s332_s6 = scalar_lea.sflag [#allocation9], %s963_s15  ;;  %s702_s10 = scalar_lea.vmem %s982_s25, 128 }
  0x85   : > { %p703_p4 = scmp.ne.s32.totalorder %s982_s25, %s702_s10  ;;  %s826_s11 = smov [#allocation8]  }
  0x86   : > { %s706_s24 = sshll.u32 %s826_s11, 4  ;;  %s707_s24 = int_to_ptr.vmem [resolvable:$false] %s706_s24 }
  0x87   : > { %p704_p7 = pnand %p703_p4, %p911_p12  ;;  %s708_s20 = scalar_lea.vmem %s707_s24, 256 }
  0x88   : > { %p709_p9 = scmp.lt.s32.totalorder %s982_s25, %s707_s24  ;;  %p710_p10 = scmp.lt.s32.totalorder %s708_s20, %s702_s10 }
  0x89   : > { %p705_p8 = pneg %p704_p7 }
  0x8a   : > { %p711_p11 = por %p710_p10, %p709_p9 }
  0x8c   : > { %p712_p0 = pnand %p711_p11, %p705_p8 }
  0x8e   : > { %715 = shalt.err (!%p712_p0)
}
  0x8f   : > { %s716_s15 = scalar_lea.hbm %s980_s8, 128  ;;  %s720_s5 = scalar_lea.hbm %s1060_s3, 256 }
  0x90   : > { %p717_p1 = scmp.ne.s32.totalorder %s980_s8, %s716_s15  ;;  %p721_p3 = scmp.lt.u32.totalorder %s980_s8, %s1060_s3 }
  0x91   : > { %p722_p5 = scmp.lt.u32.totalorder %s720_s5, %s716_s15  ;;  %p724_p7 = scmp.lt.u32.totalorder %s716_s15, %s980_s8 }
  0x92   : > { %p718_p6 = pnand %p717_p1, %p911_p12 }
  0x93   : > { %p723_p4 = por %p722_p5, %p721_p3 }
  0x94   : > { %p719_p2 = pneg %p718_p6 }
  0x95   : > { %p725_p8 = por %p724_p7, %p723_p4 }
  0x97   : > { %p726_p9 = pnand %p725_p8, %p719_p2 }
  0x99   : > { %729 = shalt.err (!%p726_p9)
}
  0x9a   : > { %526 = dma.vmem_to_hbm [thread:$0]  (%p911_p12), %s982_s25, 128, %s980_s8, %s332_s6  }
  0x9b PF: > { %s370_s26 = sand.u32 1, %s789_s12   ;;  %p1066_p10 = scmp.ge.s32.totalorder %s817_s19, 2 }
  0x9c   : > { %s371_s30 = scalar_lea.sflag [#allocation4], %s370_s26 }
  0x9d   : > { %p530_p11 = pnand %p1066_p10, %p915_p13 }
  0x9f   : > { %775 = dma.done.wait (!%p530_p11), %s371_s30, 128  }
  0xa0   : > { %777 = vsyncadd (!%p530_p11), %s371_s30, 4294967168  ;;  %s380_s17 = scalar_lea.sflag [#allocation9], %s370_s26 }
  0xa1   : > { %779 = dma.done.wait (!%p530_p11), %s380_s17, 128  }
  0xa2   : > { %781 = vsyncadd (!%p530_p11), %s380_s17, 4294967168  ;;  %s26_s19 = sadd.s32 1, %s817_s19   ;;  %s1067_s12 = smov %s793_s13 }
  0xa3   : > { %p23_p0 = scmp.ge.s32.totalorder %s26_s19, 4   ;;  %s1068_s13 = smov %s797_s14 }
  0xa4   : > { %s1069_s14 = smov %s905_s27  ;;  %s1070_s15 = smov %s805_s16 }
  0xa5   : > { %s1047_s16 = smov 0   ;;  %s1071_s17 = smov %s813_s18 }
  0xa6   : > { %s1072_s18 = smov %s1074_s22  ;;  %25 = sbr.rel (!%p23_p0) target bundleno = 11 (0xb), region = 107 }
  0xad   :  { %385 = vsyncpa [#allocation3], 1 }
  0xae   :  { %387 = vsyncpa [#allocation3 + $0x1], 1 }
  0xaf   :  { %388 = vsyncpa [#allocation6], 1 }
  0xb0   :  { %390 = vsyncpa [#allocation6 + $0x1], 1 }
  0xb1   :  { %391 = vsyncpa [#allocation4], 1 }
  0xb2   :  { %393 = vsyncpa [#allocation4 + $0x1], 1 }
  0xb3   :  { %394 = vsyncpa [#allocation9], 1 }
  0xb4   :  { %396 = vsyncpa [#allocation9 + $0x1], 1 }

</bundles_post_ra>
